<compile_context>
chip_gen: v5e
topology: v5e:2x2
jax: 0.10.0
libtpu: 0.0.40
codegen_flags: <defaults>
</compile_context>

<pallas_src>
import functools

import jax
import jax.numpy as jnp
from jax.experimental import pallas as pl
from jax.experimental.pallas import tpu as pltpu

LANE = 128      # lane width of a vreg
ROW_I8 = 32     # int8 sublane packing (also a multiple of bf16's 16)
ROW_BF16 = 16   # bf16 sublane packing


def _rup(x, m):
    return (x + m - 1) // m * m


def _pad2(a, rows, cols):
    r, c = a.shape
    return jnp.pad(a, ((0, rows - r), (0, cols - c)))


def _vmem_spec():
    return pl.BlockSpec(memory_space=pltpu.MemorySpace.VMEM)


# ---------------------------------------------------------------------------
# Fused forward kernel
# ---------------------------------------------------------------------------

def gin_fused_kernel(x_ref, adj_ref, pool_ref,
                     wpre_ref, bpre_ref,
                     w1_ref, b1_ref, w2_ref, b2_ref,
                     wpost_ref, bpost_ref,
                     wro_ref, bro_ref,
                     out_ref, x1_ref, x2_ref,
                     *, nlayer, nclass):
    f32 = jnp.float32
    bf16 = jnp.bfloat16

    # --- pre: h = x @ Wpre + bpre  (no activation in the reference) ---------
    h = jnp.dot(x_ref[...], wpre_ref[...],
                preferred_element_type=f32) + bpre_ref[...]

    # adjacency arrives int8 with (1+eps)*I already folded in; single VPU cast.
    adj = adj_ref[...].astype(bf16)                 # [Np, Np]

    # --- GINConv stack (eps = 0, torch default) + outer ReLU, fused ---------
    # agg = (1 + eps) * x_i + sum_{j in N(i)} x_j  ==  A' @ h
    # Static unroll; fine for small nlayer (use fori_loop if it grows).
    for l in range(nlayer):
        agg = jnp.dot(adj, h.astype(bf16), preferred_element_type=f32)
        t = jnp.dot(agg.astype(bf16), w1_ref[l],
                    preferred_element_type=f32) + b1_ref[l]
        t = jnp.maximum(t, 0.0)
        t = jnp.dot(t.astype(bf16), w2_ref[l],
                    preferred_element_type=f32) + b2_ref[l]
        h = jnp.maximum(t, 0.0)                     # F.relu after the conv
        # dropout: identity (eval mode)

    x2_ref[...] = h                                 # x2 = node embeddings

    # --- global_add_pool as a dense matmul: [G, N] @ [N, H] -> [G, H] -------
    pool = pool_ref[...].astype(bf16)
    x1 = jnp.dot(pool, h.astype(bf16), preferred_element_type=f32)
    x1_ref[...] = x1

    # --- post: relu(Linear) --------------------------------------------------
    p = jnp.dot(x1.astype(bf16), wpost_ref[...],
                preferred_element_type=f32) + bpost_ref[...]
    p = jnp.maximum(p, 0.0)
    # dropout: identity (eval mode)

    # --- readout + log_softmax over the real class lanes ---------------------
    logits = jnp.dot(p.astype(bf16), wro_ref[...],
                     preferred_element_type=f32) + bro_ref[...]
    lane = jax.lax.broadcasted_iota(jnp.int32, logits.shape, 1)
    logits = jnp.where(lane < nclass, logits, jnp.float32(-1e30))   # mask pads
    m = jnp.max(logits, axis=1, keepdims=True)
    e = jnp.exp(logits - m)
    lse = jnp.log(jnp.sum(e, axis=1, keepdims=True)) + m
    out_ref[...] = logits - lse


# ---------------------------------------------------------------------------
# Parameter init (deterministic, mimics torch.nn.Linear bounds 1/sqrt(fan_in))
# ---------------------------------------------------------------------------

def init_linear(key, fan_in, fan_out):
    kw, kb = jax.random.split(key)
    bound = 1.0 / jnp.sqrt(jnp.float32(fan_in))
    w = jax.random.uniform(kw, (fan_in, fan_out), jnp.float32, -bound, bound)
    b = jax.random.uniform(kb, (1, fan_out), jnp.float32, -bound, bound)
    return w, b


def init_gin_params(key, nfeat, nhid, nclass, nlayer):
    keys = jax.random.split(key, 2 * nlayer + 3)
    params = {}
    params["pre"] = init_linear(keys[0], nfeat, nhid)
    convs = []
    for l in range(nlayer):
        w1, b1 = init_linear(keys[1 + 2 * l], nhid, nhid)
        w2, b2 = init_linear(keys[2 + 2 * l], nhid, nhid)
        convs.append((w1, b1, w2, b2))
    params["convs"] = convs
    params["post"] = init_linear(keys[2 * nlayer + 1], nhid, nhid)
    params["readout"] = init_linear(keys[2 * nlayer + 2], nhid, nclass)
    return params


def pack_params(params):
    """Pad lane dims to 128, stack conv weights, downcast MXU operands to bf16."""
    nfeat, nhid = params["pre"][0].shape
    nclass = params["readout"][0].shape[1]
    Fp, Hp, Cp = _rup(nfeat, LANE), _rup(nhid, LANE), _rup(nclass, LANE)

    def pad_w(w, r, c):
        return _pad2(w, r, c).astype(jnp.bfloat16)

    def pad_b(b, c):
        return _pad2(b, 1, c)                        # biases stay f32

    packed = {
        "w_pre": pad_w(params["pre"][0], Fp, Hp),
        "b_pre": pad_b(params["pre"][1], Hp),
        "w1": jnp.stack([pad_w(w1, Hp, Hp) for (w1, _, _, _) in params["convs"]]),
        "b1": jnp.stack([pad_b(b1, Hp) for (_, b1, _, _) in params["convs"]]),
        "w2": jnp.stack([pad_w(w2, Hp, Hp) for (_, _, w2, _) in params["convs"]]),
        "b2": jnp.stack([pad_b(b2, Hp) for (_, _, _, b2) in params["convs"]]),
        "w_post": pad_w(params["post"][0], Hp, Hp),
        "b_post": pad_b(params["post"][1], Hp),
        "w_ro": pad_w(params["readout"][0], Hp, Cp),
        "b_ro": pad_b(params["readout"][1], Cp),
    }
    return packed


def prep_graph_inputs(x, adj, pool_mat, *, eps=0.0):
    """One-time pad/cast of the runtime graph tensors (hoisted out of the
    per-call hot path).  Keeps bf16/int8 copies resident in HBM."""
    N, nfeat = x.shape
    G = pool_mat.shape[0]
    Fp = _rup(nfeat, LANE)
    Np = _rup(N, ROW_I8)
    Gp = _rup(G, ROW_BF16)

    x_p = _pad2(x, Np, Fp).astype(jnp.bfloat16)
    # Fold the GIN self-loop into the adjacency: A' = A + (1+eps) * I.
    adj_aug = adj + (1.0 + eps) * jnp.eye(N, dtype=adj.dtype)
    adj_p = _pad2(adj_aug, Np, Np).astype(jnp.int8)      # small ints -> exact
    pool_p = _pad2(pool_mat, Gp, Np).astype(jnp.int8)    # 0/1 -> exact
    return x_p, adj_p, pool_p


# ---------------------------------------------------------------------------
# Forward pass (mirrors GIN.forward, eval mode) -- ONE pallas_call
# ---------------------------------------------------------------------------

@functools.partial(jax.jit, static_argnames=("n_nodes", "n_graphs", "nhid", "nclass"))
def gin_forward(packed, x_p, adj_p, pool_p, *, n_nodes, n_graphs, nhid, nclass):
    Np, Fp = x_p.shape
    Gp = pool_p.shape[0]
    nlayer, Hp, _ = packed["w1"].shape
    Cp = packed["w_ro"].shape[1]

    kernel = functools.partial(gin_fused_kernel, nlayer=nlayer, nclass=nclass)

    inputs = (x_p, adj_p, pool_p,
              packed["w_pre"], packed["b_pre"],
              packed["w1"], packed["b1"], packed["w2"], packed["b2"],
              packed["w_post"], packed["b_post"],
              packed["w_ro"], packed["b_ro"])

    flops = (2 * Np * Fp * Hp
             + nlayer * (2 * Np * Np * Hp + 4 * Np * Hp * Hp)
             + 2 * Gp * Np * Hp + 2 * Gp * Hp * Hp + 2 * Gp * Hp * Cp)
    in_bytes = sum(int(a.size) * a.dtype.itemsize for a in inputs)
    out_bytes = 4 * (Gp * Cp + Gp * Hp + Np * Hp)
    # Footprint-derived VMEM budget with headroom; capped at 64 MiB so the
    # same limit is valid on v7x (64 MiB/TC) as well as v5e/v6e (128 MiB).
    vmem_limit = int(min(max(4 * (in_bytes + out_bytes) + (2 << 20), 16 << 20),
                         64 << 20))

    out_p, x1_p, x2_p = pl.pallas_call(
        kernel,
        out_shape=(
            jax.ShapeDtypeStruct((Gp, Cp), jnp.float32),    # log_softmax
            jax.ShapeDtypeStruct((Gp, Hp), jnp.float32),    # x1 (pooled)
            jax.ShapeDtypeStruct((Np, Hp), jnp.float32),    # x2 (node embeds)
        ),
        in_specs=[_vmem_spec()] * len(inputs),
        out_specs=(_vmem_spec(), _vmem_spec(), _vmem_spec()),
        compiler_params=pltpu.CompilerParams(vmem_limit_bytes=vmem_limit),
        cost_estimate=pl.CostEstimate(
            flops=int(flops),
            transcendentals=int(2 * Gp * Cp),
            bytes_accessed=int(in_bytes + out_bytes)),
    )(*inputs)

    # Slice the real rows / lanes back out of the padded, lane-dense slabs.
    out = out_p[:n_graphs, :nclass]
    x1 = x1_p[:n_graphs, :nhid]
    x2 = x2_p[:n_nodes, :nhid]
    return out, x1, x2


# ---------------------------------------------------------------------------
# Pure-JAX reference (f32 throughout) for correctness checking
# ---------------------------------------------------------------------------

def gin_reference(params, x, adj, pool_mat):
    w, b = params["pre"]
    h = x @ w + b
    for (w1, b1, w2, b2) in params["convs"]:
        agg = adj @ h + h                      # eps = 0
        t = jnp.maximum(agg @ w1 + b1, 0.0)
        t = t @ w2 + b2
        h = jnp.maximum(t, 0.0)
    x2 = h
    x1 = pool_mat @ h
    w, b = params["post"]
    p = jnp.maximum(x1 @ w + b, 0.0)
    w, b = params["readout"]
    logits = p @ w + b
    return jax.nn.log_softmax(logits, axis=1), x1, x2


# ---------------------------------------------------------------------------
# Main
# ---------------------------------------------------------------------------

if __name__ == "__main__":
    nfeat, nhid, nclass, nlayer = 8, 32, 4, 2
    num_nodes, num_graphs = 16, 2

    key = jax.random.PRNGKey(0)
    k_params, k_x = jax.random.split(key)

    params = init_gin_params(k_params, nfeat, nhid, nclass, nlayer)
    packed = pack_params(params)

    # node features
    x = jax.random.normal(k_x, (num_nodes, nfeat), jnp.float32)

    # deterministic graph: two 8-node rings (undirected -> edges both ways)
    src, dst = [], []
    for g in range(num_graphs):
        base = g * 8
        for i in range(8):
            a, b = base + i, base + (i + 1) % 8
            src += [a, b]
            dst += [b, a]
    src = jnp.array(src, jnp.int32)
    dst = jnp.array(dst, jnp.int32)

    # dense adjacency: A[dst, src] = 1 so (A @ h)[i] = sum of neighbor features
    adj = jnp.zeros((num_nodes, num_nodes), jnp.float32).at[dst, src].add(1.0)

    # batch assignment + pool matrix P[g, n]
    batch = jnp.concatenate([jnp.zeros(8, jnp.int32), jnp.ones(8, jnp.int32)])
    pool_mat = (batch[None, :] == jnp.arange(num_graphs)[:, None]).astype(jnp.float32)

    # One-time prep (padding / int8 / bf16) -- NOT part of the per-call path.
    x_p, adj_p, pool_p = prep_graph_inputs(x, adj, pool_mat)
    x_p, adj_p, pool_p = jax.block_until_ready((x_p, adj_p, pool_p))

    out, x1, x2 = gin_forward(packed, x_p, adj_p, pool_p,
                              n_nodes=num_nodes, n_graphs=num_graphs,
                              nhid=nhid, nclass=nclass)
    jax.block_until_ready((out, x1, x2))

    assert out.shape == (num_graphs, nclass)
    assert x1.shape == (num_graphs, nhid)
    assert x2.shape == (num_nodes, nhid)
    assert bool(jnp.all(jnp.isfinite(out)))
    # log_softmax rows should sum (in prob space) to ~1
    assert jnp.allclose(jnp.sum(jnp.exp(out), axis=1), 1.0, atol=1e-3)

    # compare against an f32 pure-JAX reference (bf16 MXU -> loose tolerance)
    out_r, x1_r, x2_r = gin_reference(params, x, adj, pool_mat)
    assert jnp.allclose(out, out_r, atol=0.15, rtol=0.1), "log_softmax mismatch"
    assert jnp.allclose(x1, x1_r, atol=0.15, rtol=0.1), "pooled x1 mismatch"
    assert jnp.allclose(x2, x2_r, atol=0.15, rtol=0.1), "node embeds x2 mismatch"

    print("KERNEL_OK")
</pallas_src>

<mosaic_0001>
module attributes {stable_mosaic.version = 11 : i64} {
  func.func @gin_fused_kernel(%arg0: memref<32x128xbf16, #tpu.memory_space<vmem>>, %arg1: memref<32x32xi8, #tpu.memory_space<vmem>>, %arg2: memref<16x32xi8, #tpu.memory_space<vmem>>, %arg3: memref<128x128xbf16, #tpu.memory_space<vmem>>, %arg4: memref<1x128xf32, #tpu.memory_space<vmem>>, %arg5: memref<2x128x128xbf16, #tpu.memory_space<vmem>>, %arg6: memref<2x1x128xf32, #tpu.memory_space<vmem>>, %arg7: memref<2x128x128xbf16, #tpu.memory_space<vmem>>, %arg8: memref<2x1x128xf32, #tpu.memory_space<vmem>>, %arg9: memref<128x128xbf16, #tpu.memory_space<vmem>>, %arg10: memref<1x128xf32, #tpu.memory_space<vmem>>, %arg11: memref<128x128xbf16, #tpu.memory_space<vmem>>, %arg12: memref<1x128xf32, #tpu.memory_space<vmem>>, %arg13: memref<16x128xf32, #tpu.memory_space<vmem>>, %arg14: memref<16x128xf32, #tpu.memory_space<vmem>>, %arg15: memref<32x128xf32, #tpu.memory_space<vmem>>) attributes {dimension_semantics = [], scalar_prefetch = 0 : i64, scratch_operands = 0 : i64, tpu.core_type = #tpu.core_type<tc>} {
    %c0 = arith.constant 0 : index
    %c0_0 = arith.constant 0 : index
    %0 = vector.load %arg0[%c0, %c0_0] : memref<32x128xbf16, #tpu.memory_space<vmem>>, vector<32x128xbf16>
    %c0_1 = arith.constant 0 : index
    %c0_2 = arith.constant 0 : index
    %1 = vector.load %arg3[%c0_1, %c0_2] : memref<128x128xbf16, #tpu.memory_space<vmem>>, vector<128x128xbf16>
    %cst = arith.constant dense<0.000000e+00> : vector<32x128xf32>
    %2 = tpu.matmul %0, %1, %cst {dimension_numbers = #tpu.dot_dimension_numbers<[1], [0], [0], [1], [0, 0, 1, 1], [], []>} : vector<32x128xbf16>, vector<128x128xbf16>, vector<32x128xf32> -> vector<32x128xf32>
    %c0_3 = arith.constant 0 : index
    %c0_4 = arith.constant 0 : index
    %3 = vector.load %arg4[%c0_3, %c0_4] : memref<1x128xf32, #tpu.memory_space<vmem>>, vector<1x128xf32>
    %4 = vector.broadcast %3 : vector<1x128xf32> to vector<32x128xf32>
    %5 = arith.addf %2, %4 : vector<32x128xf32>
    %c0_5 = arith.constant 0 : index
    %c0_6 = arith.constant 0 : index
    %6 = vector.load %arg1[%c0_5, %c0_6] : memref<32x32xi8, #tpu.memory_space<vmem>>, vector<32x32xi8>
    %7 = arith.sitofp %6 : vector<32x32xi8> to vector<32x32xbf16>
    %8 = arith.truncf %5 : vector<32x128xf32> to vector<32x128xbf16>
    %cst_7 = arith.constant dense<0.000000e+00> : vector<32x128xf32>
    %9 = tpu.matmul %7, %8, %cst_7 {dimension_numbers = #tpu.dot_dimension_numbers<[1], [0], [0], [1], [0, 0, 1, 1], [], []>} : vector<32x32xbf16>, vector<32x128xbf16>, vector<32x128xf32> -> vector<32x128xf32>
    %10 = arith.truncf %9 : vector<32x128xf32> to vector<32x128xbf16>
    %c0_8 = arith.constant 0 : index
    %c0_9 = arith.constant 0 : index
    %c0_10 = arith.constant 0 : index
    %11 = vector.load %arg5[%c0_8, %c0_9, %c0_10] : memref<2x128x128xbf16, #tpu.memory_space<vmem>>, vector<1x128x128xbf16>
    %12 = vector.shape_cast %11 : vector<1x128x128xbf16> to vector<128x128xbf16>
    %cst_11 = arith.constant dense<0.000000e+00> : vector<32x128xf32>
    %13 = tpu.matmul %10, %12, %cst_11 {dimension_numbers = #tpu.dot_dimension_numbers<[1], [0], [0], [1], [0, 0, 1, 1], [], []>} : vector<32x128xbf16>, vector<128x128xbf16>, vector<32x128xf32> -> vector<32x128xf32>
    %c0_12 = arith.constant 0 : index
    %c0_13 = arith.constant 0 : index
    %c0_14 = arith.constant 0 : index
    %14 = vector.load %arg6[%c0_12, %c0_13, %c0_14] : memref<2x1x128xf32, #tpu.memory_space<vmem>>, vector<1x1x128xf32>
    %15 = vector.shape_cast %14 : vector<1x1x128xf32> to vector<1x128xf32>
    %16 = vector.broadcast %15 : vector<1x128xf32> to vector<32x128xf32>
    %17 = arith.addf %13, %16 : vector<32x128xf32>
    %cst_15 = arith.constant 0.000000e+00 : f32
    %18 = vector.broadcast %cst_15 : f32 to vector<32x128xf32>
    %19 = arith.maximumf %17, %18 : vector<32x128xf32>
    %20 = arith.truncf %19 : vector<32x128xf32> to vector<32x128xbf16>
    %c0_16 = arith.constant 0 : index
    %c0_17 = arith.constant 0 : index
    %c0_18 = arith.constant 0 : index
    %21 = vector.load %arg7[%c0_16, %c0_17, %c0_18] : memref<2x128x128xbf16, #tpu.memory_space<vmem>>, vector<1x128x128xbf16>
    %22 = vector.shape_cast %21 : vector<1x128x128xbf16> to vector<128x128xbf16>
    %cst_19 = arith.constant dense<0.000000e+00> : vector<32x128xf32>
    %23 = tpu.matmul %20, %22, %cst_19 {dimension_numbers = #tpu.dot_dimension_numbers<[1], [0], [0], [1], [0, 0, 1, 1], [], []>} : vector<32x128xbf16>, vector<128x128xbf16>, vector<32x128xf32> -> vector<32x128xf32>
    %c0_20 = arith.constant 0 : index
    %c0_21 = arith.constant 0 : index
    %c0_22 = arith.constant 0 : index
    %24 = vector.load %arg8[%c0_20, %c0_21, %c0_22] : memref<2x1x128xf32, #tpu.memory_space<vmem>>, vector<1x1x128xf32>
    %25 = vector.shape_cast %24 : vector<1x1x128xf32> to vector<1x128xf32>
    %26 = vector.broadcast %25 : vector<1x128xf32> to vector<32x128xf32>
    %27 = arith.addf %23, %26 : vector<32x128xf32>
    %cst_23 = arith.constant 0.000000e+00 : f32
    %28 = vector.broadcast %cst_23 : f32 to vector<32x128xf32>
    %29 = arith.maximumf %27, %28 : vector<32x128xf32>
    %30 = arith.truncf %29 : vector<32x128xf32> to vector<32x128xbf16>
    %cst_24 = arith.constant dense<0.000000e+00> : vector<32x128xf32>
    %31 = tpu.matmul %7, %30, %cst_24 {dimension_numbers = #tpu.dot_dimension_numbers<[1], [0], [0], [1], [0, 0, 1, 1], [], []>} : vector<32x32xbf16>, vector<32x128xbf16>, vector<32x128xf32> -> vector<32x128xf32>
    %32 = arith.truncf %31 : vector<32x128xf32> to vector<32x128xbf16>
    %c1 = arith.constant 1 : index
    %c0_25 = arith.constant 0 : index
    %c0_26 = arith.constant 0 : index
    %33 = vector.load %arg5[%c1, %c0_25, %c0_26] : memref<2x128x128xbf16, #tpu.memory_space<vmem>>, vector<1x128x128xbf16>
    %34 = vector.shape_cast %33 : vector<1x128x128xbf16> to vector<128x128xbf16>
    %cst_27 = arith.constant dense<0.000000e+00> : vector<32x128xf32>
    %35 = tpu.matmul %32, %34, %cst_27 {dimension_numbers = #tpu.dot_dimension_numbers<[1], [0], [0], [1], [0, 0, 1, 1], [], []>} : vector<32x128xbf16>, vector<128x128xbf16>, vector<32x128xf32> -> vector<32x128xf32>
    %c1_28 = arith.constant 1 : index
    %c0_29 = arith.constant 0 : index
    %c0_30 = arith.constant 0 : index
    %36 = vector.load %arg6[%c1_28, %c0_29, %c0_30] : memref<2x1x128xf32, #tpu.memory_space<vmem>>, vector<1x1x128xf32>
    %37 = vector.shape_cast %36 : vector<1x1x128xf32> to vector<1x128xf32>
    %38 = vector.broadcast %37 : vector<1x128xf32> to vector<32x128xf32>
    %39 = arith.addf %35, %38 : vector<32x128xf32>
    %cst_31 = arith.constant 0.000000e+00 : f32
    %40 = vector.broadcast %cst_31 : f32 to vector<32x128xf32>
    %41 = arith.maximumf %39, %40 : vector<32x128xf32>
    %42 = arith.truncf %41 : vector<32x128xf32> to vector<32x128xbf16>
    %c1_32 = arith.constant 1 : index
    %c0_33 = arith.constant 0 : index
    %c0_34 = arith.constant 0 : index
    %43 = vector.load %arg7[%c1_32, %c0_33, %c0_34] : memref<2x128x128xbf16, #tpu.memory_space<vmem>>, vector<1x128x128xbf16>
    %44 = vector.shape_cast %43 : vector<1x128x128xbf16> to vector<128x128xbf16>
    %cst_35 = arith.constant dense<0.000000e+00> : vector<32x128xf32>
    %45 = tpu.matmul %42, %44, %cst_35 {dimension_numbers = #tpu.dot_dimension_numbers<[1], [0], [0], [1], [0, 0, 1, 1], [], []>} : vector<32x128xbf16>, vector<128x128xbf16>, vector<32x128xf32> -> vector<32x128xf32>
    %c1_36 = arith.constant 1 : index
    %c0_37 = arith.constant 0 : index
    %c0_38 = arith.constant 0 : index
    %46 = vector.load %arg8[%c1_36, %c0_37, %c0_38] : memref<2x1x128xf32, #tpu.memory_space<vmem>>, vector<1x1x128xf32>
    %47 = vector.shape_cast %46 : vector<1x1x128xf32> to vector<1x128xf32>
    %48 = vector.broadcast %47 : vector<1x128xf32> to vector<32x128xf32>
    %49 = arith.addf %45, %48 : vector<32x128xf32>
    %cst_39 = arith.constant 0.000000e+00 : f32
    %50 = vector.broadcast %cst_39 : f32 to vector<32x128xf32>
    %51 = arith.maximumf %49, %50 : vector<32x128xf32>
    %c0_40 = arith.constant 0 : index
    %c0_41 = arith.constant 0 : index
    %52 = vector.load %arg15[%c0_40, %c0_41] : memref<32x128xf32, #tpu.memory_space<vmem>>, vector<32x128xf32>
    tpu.vector_store %arg15[%c0_40, %c0_41], %51 {strides = array<i32>} : memref<32x128xf32, #tpu.memory_space<vmem>>, vector<32x128xf32>,
    %c0_42 = arith.constant 0 : index
    %c0_43 = arith.constant 0 : index
    %53 = vector.load %arg2[%c0_42, %c0_43] : memref<16x32xi8, #tpu.memory_space<vmem>>, vector<16x32xi8>
    %54 = arith.sitofp %53 : vector<16x32xi8> to vector<16x32xbf16>
    %55 = arith.truncf %51 : vector<32x128xf32> to vector<32x128xbf16>
    %cst_44 = arith.constant dense<0.000000e+00> : vector<16x128xf32>
    %56 = tpu.matmul %54, %55, %cst_44 {dimension_numbers = #tpu.dot_dimension_numbers<[1], [0], [0], [1], [0, 0, 1, 1], [], []>} : vector<16x32xbf16>, vector<32x128xbf16>, vector<16x128xf32> -> vector<16x128xf32>
    %c0_45 = arith.constant 0 : index
    %c0_46 = arith.constant 0 : index
    %57 = vector.load %arg14[%c0_45, %c0_46] : memref<16x128xf32, #tpu.memory_space<vmem>>, vector<16x128xf32>
    tpu.vector_store %arg14[%c0_45, %c0_46], %56 {strides = array<i32>} : memref<16x128xf32, #tpu.memory_space<vmem>>, vector<16x128xf32>,
    %58 = arith.truncf %56 : vector<16x128xf32> to vector<16x128xbf16>
    %c0_47 = arith.constant 0 : index
    %c0_48 = arith.constant 0 : index
    %59 = vector.load %arg9[%c0_47, %c0_48] : memref<128x128xbf16, #tpu.memory_space<vmem>>, vector<128x128xbf16>
    %cst_49 = arith.constant dense<0.000000e+00> : vector<16x128xf32>
    %60 = tpu.matmul %58, %59, %cst_49 {dimension_numbers = #tpu.dot_dimension_numbers<[1], [0], [0], [1], [0, 0, 1, 1], [], []>} : vector<16x128xbf16>, vector<128x128xbf16>, vector<16x128xf32> -> vector<16x128xf32>
    %c0_50 = arith.constant 0 : index
    %c0_51 = arith.constant 0 : index
    %61 = vector.load %arg10[%c0_50, %c0_51] : memref<1x128xf32, #tpu.memory_space<vmem>>, vector<1x128xf32>
    %62 = vector.broadcast %61 : vector<1x128xf32> to vector<16x128xf32>
    %63 = arith.addf %60, %62 : vector<16x128xf32>
    %cst_52 = arith.constant 0.000000e+00 : f32
    %64 = vector.broadcast %cst_52 : f32 to vector<16x128xf32>
    %65 = arith.maximumf %63, %64 : vector<16x128xf32>
    %66 = arith.truncf %65 : vector<16x128xf32> to vector<16x128xbf16>
    %c0_53 = arith.constant 0 : index
    %c0_54 = arith.constant 0 : index
    %67 = vector.load %arg11[%c0_53, %c0_54] : memref<128x128xbf16, #tpu.memory_space<vmem>>, vector<128x128xbf16>
    %cst_55 = arith.constant dense<0.000000e+00> : vector<16x128xf32>
    %68 = tpu.matmul %66, %67, %cst_55 {dimension_numbers = #tpu.dot_dimension_numbers<[1], [0], [0], [1], [0, 0, 1, 1], [], []>} : vector<16x128xbf16>, vector<128x128xbf16>, vector<16x128xf32> -> vector<16x128xf32>
    %c0_56 = arith.constant 0 : index
    %c0_57 = arith.constant 0 : index
    %69 = vector.load %arg12[%c0_56, %c0_57] : memref<1x128xf32, #tpu.memory_space<vmem>>, vector<1x128xf32>
    %70 = vector.broadcast %69 : vector<1x128xf32> to vector<16x128xf32>
    %71 = arith.addf %68, %70 : vector<16x128xf32>
    %72 = tpu.iota {dimensions = array<i32: 1>} : vector<16x128xi32>
    %c4_i32 = arith.constant 4 : i32
    %73 = vector.broadcast %c4_i32 : i32 to vector<16x128xi32>
    %74 = arith.cmpi slt, %72, %73 : vector<16x128xi32>
    %cst_58 = arith.constant -1.000000e+30 : f32
    %75 = vector.broadcast %cst_58 : f32 to vector<16x128xf32>
    %76 = arith.select %74, %71, %75 : vector<16x128xi1>, vector<16x128xf32>
    %cst_59 = arith.constant dense<0xFF800000> : vector<16xf32>
    %77 = vector.multi_reduction <maximumf>, %76, %cst_59 [1] : vector<16x128xf32> to vector<16xf32>
    %78 = vector.shape_cast %77 : vector<16xf32> to vector<16x1xf32>
    %79 = vector.broadcast %78 : vector<16x1xf32> to vector<16x128xf32>
    %80 = arith.subf %76, %79 : vector<16x128xf32>
    %81 = math.exp %80 : vector<16x128xf32>
    %cst_60 = arith.constant dense<0.000000e+00> : vector<16xf32>
    %82 = vector.multi_reduction <add>, %81, %cst_60 [1] : vector<16x128xf32> to vector<16xf32>
    %83 = vector.shape_cast %82 : vector<16xf32> to vector<16x1xf32>
    %84 = math.log %83 : vector<16x1xf32>
    %85 = arith.addf %84, %78 : vector<16x1xf32>
    %86 = vector.broadcast %85 : vector<16x1xf32> to vector<16x128xf32>
    %87 = arith.subf %76, %86 : vector<16x128xf32>
    %c0_61 = arith.constant 0 : index
    %c0_62 = arith.constant 0 : index
    %88 = vector.load %arg13[%c0_61, %c0_62] : memref<16x128xf32, #tpu.memory_space<vmem>>, vector<16x128xf32>
    tpu.vector_store %arg13[%c0_61, %c0_62], %87 {strides = array<i32>} : memref<16x128xf32, #tpu.memory_space<vmem>>, vector<16x128xf32>,
    return
  }
}

</mosaic_0001>

<bundles_post_ra>
// kernel: gin_forward.1
= control target key start
LH: loop header
LB: loop body
LE: loop exit
PB: predicated region body
PF: predicated region fallthrough
CT: control target
= control target key end

     0   :  { %21 = vsyncpa [#allocation3], 0  ;;  %s1760_s0 = inlined_call_operand.hbm [shape: bf16[32,128], index: 0, kind: input, shape index: {}]   ;;  %s1761_s1 = inlined_call_operand.vmem [shape: s8[32,32], index: 1, kind: input, shape index: {}]   ;;  %s1762_s2 = inlined_call_operand.hbm [shape: s8[16,32], index: 2, kind: input, shape index: {}]   ;;  %s1763_s3 = inlined_call_operand.hbm [shape: bf16[128,128], index: 3, kind: input, shape index: {}]   ;;  %s1764_s4 = inlined_call_operand.vmem [shape: f32[1,128], index: 4, kind: input, shape index: {}]   ;;  %s1765_s5 = inlined_call_operand.hbm [shape: bf16[2,128,128], index: 5, kind: input, shape index: {}]   ;;  %s1766_s6 = inlined_call_operand.hbm [shape: f32[2,1,128], index: 6, kind: input, shape index: {}]   ;;  %s1767_s7 = inlined_call_operand.hbm [shape: bf16[2,128,128], index: 7, kind: input, shape index: {}]   ;;  %s1768_s8 = inlined_call_operand.hbm [shape: f32[2,1,128], index: 8, kind: input, shape index: {}]   ;;  %s1769_s9 = inlined_call_operand.hbm [shape: bf16[128,128], index: 9, kind: input, shape index: {}]   ;;  %s1770_s10 = inlined_call_operand.hbm [shape: f32[1,128], index: 10, kind: input, shape index: {}]   ;;  %s1771_s11 = inlined_call_operand.hbm [shape: bf16[128,128], index: 11, kind: input, shape index: {}]   ;;  %s1772_s12 = inlined_call_operand.vmem [shape: f32[1,128], index: 12, kind: input, shape index: {}]   ;;  %s1773_s13 = inlined_call_operand.vmem [shape: f32[16,128], index: 13, kind: output, shape index: {0}]   ;;  %s1774_s14 = inlined_call_operand.vmem [shape: f32[16,128], index: 14, kind: output, shape index: {1}]   ;;  %s1775_s15 = inlined_call_operand.vmem [shape: f32[32,128], index: 15, kind: output, shape index: {2}]  }
   0x1   :  { %22 = vsyncpa [#allocation5], 0 }
   0x2   :  { %23 = vsyncpa [#allocation8], 0 }
   0x3   :  { %24 = vsyncpa [#allocation11], 0 }
   0x4   :  { %25 = vsyncpa [#allocation14], 0  ;;  %s46_s20 = sshll.u32 %s1762_s2, 4  ;;  %s47_s20 = int_to_ptr.hbm [resolvable:$true] %s46_s20 }
   0x5   :  { %26 = vsyncpa [#allocation17], 0  ;;  %s1570_s21 = smov [#allocation4]   ;;  %s1571_s23 = smov 32  }
   0x6   :  { %s48_s22 = sshll.u32 %s1570_s21, 4  ;;  %s1572_s24 = smov 2   ;;  %s49_s22 = int_to_ptr.vmem [resolvable:$true] %s48_s22 }
   0x7   :  { %54 = dma.hbm_to_vmem [thread:$0]  %s47_s20, 64, %s49_s22, [#allocation5], %s1571_s23, %s1571_s23, %s1572_s24  }
   0x8   :  { %s74_s27 = sshll.u32 %s1765_s5, 4  ;;  %s1573_s28 = smov [#allocation7]   ;;  %s75_s27 = int_to_ptr.hbm [resolvable:$true] %s74_s27 }
   0x9   :  { %s76_s29 = sshll.u32 %s1573_s28, 4  ;;  %s100_s17 = sshll.u32 %s1767_s7, 4  ;;  %s77_s29 = int_to_ptr.vmem [resolvable:$true] %s76_s29  ;;  %s101_s17 = int_to_ptr.hbm [resolvable:$true] %s100_s17 }
   0xa   :  { %s1574_s2 = smov 64   ;;  %s1575_s18 = smov 4  }
   0xb   :  { %82 = dma.hbm_to_vmem [thread:$0]  %s75_s27, 2048, %s77_s29, [#allocation8], %s1574_s2, %s1574_s2, %s1575_s18  }
   0xc   :  { %s126_s21 = sshll.u32 %s1769_s9, 4  ;;  %s1576_s5 = smov [#allocation10]   ;;  %s127_s21 = int_to_ptr.hbm [resolvable:$true] %s126_s21 }
   0xd   :  { %s102_s22 = sshll.u32 %s1576_s5, 4  ;;  %s1577_s7 = smov [#allocation13]   ;;  %s103_s22 = int_to_ptr.vmem [resolvable:$true] %s102_s22 }
   0xe   :  { %108 = dma.hbm_to_vmem [thread:$0]  %s101_s17, 2048, %s103_s22, [#allocation11], %s1574_s2, %s1574_s2, %s1575_s18  }
   0xf   :  { %s128_s23 = sshll.u32 %s1577_s7, 4  ;;  %s31_s26 = sshll.u32 %s1760_s0, 4  ;;  %s129_s23 = int_to_ptr.vmem [resolvable:$true] %s128_s23  ;;  %s32_s26 = int_to_ptr.hbm [resolvable:$true] %s31_s26 }
  0x10   :  { %134 = dma.hbm_to_vmem [thread:$0]  %s127_s21, 1024, %s129_s23, [#allocation14], %s1574_s2, %s1574_s2, %s1575_s18  }
  0x11   :  { %s59_s28 = sshll.u32 %s1763_s3, 4  ;;  %s1578_s29 = smov [#allocation2]   ;;  %s60_s28 = int_to_ptr.hbm [resolvable:$true] %s59_s28 }
  0x12   :  { %s33_s30 = sshll.u32 %s1578_s29, 4  ;;  %s1579_s16 = smov [#allocation6]   ;;  %s34_s30 = int_to_ptr.vmem [resolvable:$true] %s33_s30 }
  0x13   :  { %39 = dma.hbm_to_vmem [thread:$0]  %s32_s26, 256, %s34_s30, [#allocation3], %s1574_s2, %s1574_s2, %s1575_s18  }
  0x14   :  { %s61_s0 = sshll.u32 %s1579_s16, 4  ;;  %s87_s20 = sshll.u32 %s1766_s6, 4  ;;  %s62_s0 = int_to_ptr.vmem [resolvable:$true] %s61_s0  ;;  %s88_s20 = int_to_ptr.hbm [resolvable:$true] %s87_s20 }
  0x15   :  { %67 = dma.hbm_to_vmem [thread:$0]  %s60_s28, 1024, %s62_s0, [#allocation5], %s1574_s2, %s1574_s2, %s1575_s18  }
  0x16   :  { %s1580_s3 = smov [#allocation9]   ;;  %s113_s7 = sshll.u32 %s1768_s8, 4  ;;  %s114_s7 = int_to_ptr.hbm [resolvable:$true] %s113_s7 }
  0x17   :  { %s89_s21 = sshll.u32 %s1580_s3, 4  ;;  %s1581_s23 = smov 16   ;;  %s90_s21 = int_to_ptr.vmem [resolvable:$true] %s89_s21 }
  0x18   :  { %s1582_s24 = smov 1   ;;  %s1583_s25 = smov [#allocation12]  }
  0x19   :  { %95 = dma.hbm_to_vmem [thread:$0]  %s88_s20, 32, %s90_s21, [#allocation8], %s1581_s23, %s1581_s23, %s1582_s24  }
  0x1a   :  { %s115_s26 = sshll.u32 %s1583_s25, 4  ;;  %s140_s27 = sshll.u32 %s1770_s10, 4  ;;  %s116_s26 = int_to_ptr.vmem [resolvable:$true] %s115_s26  ;;  %s141_s27 = int_to_ptr.hbm [resolvable:$true] %s140_s27 }
  0x1b   :  { %121 = dma.hbm_to_vmem [thread:$0]  %s114_s7, 32, %s116_s26, [#allocation11], %s1581_s23, %s1581_s23, %s1582_s24  }
  0x1c   :  { %s150_s30 = sshll.u32 %s1771_s11, 4  ;;  %s1584_s16 = smov [#allocation15]   ;;  %s151_s30 = int_to_ptr.hbm [resolvable:$true] %s150_s30 }
  0x1d   :  { %s142_s0 = sshll.u32 %s1584_s16, 4  ;;  %s1585_s8 = smov [#allocation16]   ;;  %s143_s0 = int_to_ptr.vmem [resolvable:$true] %s142_s0 }
  0x1e   :  { %145 = dma.hbm_to_vmem [thread:$0]  %s141_s27, 16, %s143_s0, [#allocation14]  }
  0x1f   :  { %s152_s17 = sshll.u32 %s1585_s8, 4  ;;  %s153_s17 = int_to_ptr.vmem [resolvable:$true] %s152_s17 }
  0x20   :  { %158 = dma.hbm_to_vmem [thread:$0]  %s151_s30, 1024, %s153_s17, [#allocation17], %s1574_s2, %s1574_s2, %s1575_s18  }
  0x21   :  { %1558 = dma.done.wait [#allocation3], 256  }
  0x22   :  { %1559 = vsyncadd [#allocation3], 4294967040 }
  0x23   :  { %1560 = dma.done.wait [#allocation5], 1088  }
  0x24   :  { %1561 = vsyncadd [#allocation5], 4294966208 }
  0x25   :  { %1562 = dma.done.wait [#allocation8], 2080  }
  0x26   :  { %1563 = vsyncadd [#allocation8], 4294965216 }
  0x27   :  { %1564 = dma.done.wait [#allocation11], 2080  }
  0x28   :  { %1565 = vsyncadd [#allocation11], 4294965216 }
  0x29   :  { %1566 = dma.done.wait [#allocation14], 1040  }
  0x2a   :  { %1567 = vsyncadd [#allocation14], 4294966256 }
  0x2b   :  { %1568 = dma.done.wait [#allocation17], 1024  }
  0x2c   :  { %1569 = vsyncadd [#allocation17], 4294966272  ;;  %v1234_v0 = vld [vmem:[#allocation6 + $0x38] sm:$0xff]  ;;  %v1233_v1 = vld [vmem:[#allocation6 + $0x30] sm:$0xff]  ;;  %vm318_vm0 = vcmask 261120  }
  0x2d   :  { %286 = vmatpush.bf16.msra.mxu0 %v1234_v0  ;;  %v1232_v2 = vld [vmem:[#allocation6 + $0x28] sm:$0xff]  ;;  %v1231_v3 = vld [vmem:[#allocation6 + $0x20] sm:$0xff]  ;;  %v1230_v4 = vld [vmem:[#allocation6 + $0x18] sm:$0xff] }
  0x2e   :  { %v1229_v5 = vld [vmem:[#allocation6 + $0x10] sm:$0xff]  ;;  %v1228_v6 = vld [vmem:[#allocation6 + $0x8] sm:$0xff]  ;;  %v1227_v7 = vld [vmem:[#allocation6] sm:$0xff] }
  0x2f   :  { %v1225_v8 = vld [vmem:[#allocation2] sm:$0xff]  ;;  %v1226_v9 = vld [vmem:[#allocation2 + $0x8] sm:$0xff]  ;;  %v305_v14 = vld [vmem:[%s1761_s1] sm:$0xff] }
  0x30   :  { %v1242_v13 = vld [vmem:[#allocation7 + $0x38] sm:$0xff]  ;;  %v1241_v15 = vld [vmem:[#allocation7 + $0x30] sm:$0xff]  ;;  %v1303_v16 = vld [vmem:[%s1764_s4] ss:$0 sm:$0xff]  ;;  %v306_v18 = vunpack.c.0.s8 %v305_v14  ;;  %v307_v19 = vunpack.c.1.s8 %v305_v14  ;;  %v308_v32 = vunpack.c.2.s8 %v305_v14  ;;  %v309_v33 = vunpack.c.3.s8 %v305_v14 }
  0x31   :  { %287 = vmatpush.bf16.msra.mxu0 %v1233_v1  ;;  %414 = vmatpush.bf16.msra.mxu2 %v1242_v13  ;;  %v1240_v22 = vld [vmem:[#allocation7 + $0x28] sm:$0xff]  ;;  %v1239_v28 = vld [vmem:[#allocation7 + $0x20] sm:$0xff]  ;;  %v1238_v31 = vld [vmem:[#allocation7 + $0x18] sm:$0xff] }
  0x32   :  { %v310_v25 = vcvt.s32.f32 %v306_v18  ;;  %v311_v26 = vcvt.s32.f32 %v307_v19  ;;  %v312_v34 = vcvt.s32.f32 %v308_v32  ;;  %v313_v35 = vcvt.s32.f32 %v309_v33  ;;  %v1237_v37 = vld [vmem:[#allocation7 + $0x10] sm:$0xff]  ;;  %v1236_v38 = vld [vmem:[#allocation7 + $0x8] sm:$0xff]  ;;  %v1235_v39 = vld [vmem:[#allocation7] sm:$0xff] }
  0x33   :  { %v1250_v40 = vld [vmem:[#allocation10 + $0x38] sm:$0xff]  ;;  %v1249_v41 = vld [vmem:[#allocation10 + $0x30] sm:$0xff]  ;;  %v1248_v43 = vld [vmem:[#allocation10 + $0x28] sm:$0xff] }
  0x34   :  { %v1720_v30 = vpack.c.bf16 %v311_v26, %v310_v25  ;;  %v1724_v36 = vpack.c.bf16 %v313_v35, %v312_v34  ;;  %507 = vmatpush.bf16.msra.mxu3 %v1250_v40  ;;  %v1247_v44 = vld [vmem:[#allocation10 + $0x20] sm:$0xff]  ;;  %v1246_v50 = vld [vmem:[#allocation10 + $0x18] sm:$0xff]  ;;  %v1245_v51 = vld [vmem:[#allocation10 + $0x10] sm:$0xff] }
  0x35   :  { %288 = vmatpush.bf16.msra.mxu0 %v1232_v2  ;;  %415 = vmatpush.bf16.msra.mxu2 %v1241_v15  ;;  %v1244_v52 = vld [vmem:[#allocation10 + $0x8] sm:$0xff]  ;;  %v1243_v53 = vld [vmem:[#allocation10] sm:$0xff]  ;;  %v1304_v55 = vld [vmem:[#allocation9] ss:$0 sm:$0xff] }
  0x36   :  { %v1256_v18 = vld [vmem:[#allocation7 + $0x68] sm:$0xff]  ;;  %v1253_v25 = vld [vmem:[#allocation7 + $0x50] sm:$0xff] }
  0x37   :  { %v1252_v26 = vld [vmem:[#allocation7 + $0x48] sm:$0xff] }
  0x38   :  { %508 = vmatpush.bf16.msra.mxu3 %v1249_v41  ;;  %v1264_v32 = vld [vmem:[#allocation10 + $0x68] sm:$0xff]  ;;  %v1263_v33 = vld [vmem:[#allocation10 + $0x60] sm:$0xff] }
  0x39   :  { %289 = vmatpush.bf16.msra.mxu0 %v1231_v3  ;;  %416 = vmatpush.bf16.msra.mxu2 %v1240_v22  ;;  %v1255_v22 = vld [vmem:[#allocation7 + $0x60] sm:$0xff]  ;;  %v1260_v40 = vld [vmem:[#allocation10 + $0x48] sm:$0xff] }
  0x3a   :  { %v1259_v41 = vld [vmem:[#allocation10 + $0x40] sm:$0xff] }
  0x3c   :  { %509 = vmatpush.bf16.msra.mxu3 %v1248_v43  ;;  %v1306_v43 = vld [vmem:[#allocation9 + $0x1] ss:$0 sm:$0xff] }
  0x3d   :  { %290 = vmatpush.bf16.msra.mxu0 %v1230_v4  ;;  %417 = vmatpush.bf16.msra.mxu2 %v1239_v28  ;;  %v1266_v28 = vld [vmem:[#allocation10 + $0x78] sm:$0xff] }
  0x40   :  { %510 = vmatpush.bf16.msra.mxu3 %v1247_v44 }
  0x41   :  { %291 = vmatpush.bf16.msra.mxu0 %v1229_v5  ;;  %418 = vmatpush.bf16.msra.mxu2 %v1238_v31 }
  0x44   :  { %511 = vmatpush.bf16.msra.mxu3 %v1246_v50 }
  0x45   :  { %292 = vmatpush.bf16.msra.mxu0 %v1228_v6  ;;  %419 = vmatpush.bf16.msra.mxu2 %v1237_v37 }
  0x48   :  { %512 = vmatpush.bf16.msra.mxu3 %v1245_v51 }
  0x49   :  { %293 = vmatpush.bf16.msra.mxu0 %v1227_v7  ;;  %420 = vmatpush.bf16.msra.mxu2 %v1236_v38  ;;  %v1262_v38 = vld [vmem:[#allocation10 + $0x58] sm:$0xff] }
  0x4c   :  { %294 = vmatmul.bf16.vlgmr.msra.gmra.mxu0 %v1225_v8  ;;  %513 = vmatpush.bf16.msra.mxu3 %v1244_v52  ;;  %v1305_v8 = vld [vmem:[#allocation12] ss:$0 sm:$0xff] }
  0x4d   :  { %421 = vmatpush.bf16.msra.mxu2 %v1235_v39  ;;  %v1261_v39 = vld [vmem:[#allocation10 + $0x50] sm:$0xff] }
  0x50   :  { %514 = vmatpush.bf16.msra.mxu3 %v1243_v53 }
  0x51   :  { %718 = vmatpush.bf16.msrb.mxu2 %v1266_v28 }
  0x5c   :  { %299 = vmatmul.bf16.gmra.mxu0 %v1226_v9  ;;  %v1258_v9 = vld [vmem:[#allocation7 + $0x78] sm:$0xff] }
  0x5d   :  { %623 = vmatpush.bf16.msrb.mxu0 %v1258_v9 }
  0xc9   :  { %v295_v10 = vpop.f32.mrf.mxu0 }
  0xca   :  { %v296_v27 = vadd.f32 %v1303_v16, %v295_v10 }
  0xd1   :  { %v297_v11 = vpop.f32.mrf.mxu0 }
  0xd2   :  { %v298_v23 = vadd.f32 %v1303_v16, %v297_v11 }
  0xd4   :  { %v316_v29 = vpack.c.bf16 %v298_v23, %v296_v27  ;;  %v1251_v27 = vld [vmem:[#allocation7 + $0x40] sm:$0xff] }
  0xd9   :  { %v300_v12 = vpop.f32.mrf.mxu0 }
  0xda   :  { %v301_v20 = vadd.f32 %v1303_v16, %v300_v12  ;;  %v1257_v12 = vld [vmem:[#allocation7 + $0x70] sm:$0xff] }
  0xdb   :  { %624 = vmatpush.bf16.msrb.mxu0 %v1257_v12 }
  0xdf   :  { %625 = vmatpush.bf16.msrb.mxu0 %v1256_v18 }
  0xe1   :  { %v302_v17 = vpop.f32.mrf.mxu0 }
  0xe2   :  { %v303_v21 = vadd.f32 %v1303_v16, %v302_v17 }
  0xe3   :  { %626 = vmatpush.bf16.msrb.mxu0 %v1255_v22  ;;  %v1282_v22 = vld [vmem:[#allocation16 + $0x38] sm:$0xff] }
  0xe4   :  { %v317_v24 = vpack.c.bf16 %v303_v21, %v301_v20 }
  0xe6   :  { %331 = vmatpush.bf16.msra.mxu1 %v317_v24  ;;  %v1254_v24 = vld [vmem:[#allocation7 + $0x58] sm:$0xff] }
  0xe7   :  { %627 = vmatpush.bf16.msrb.mxu0 %v1254_v24  ;;  %v1280_v24 = vld [vmem:[#allocation16 + $0x28] sm:$0xff] }
  0xea   :  { %332 = vmatpush.bf16.msra.mxu1 %v316_v29  ;;  %v1265_v29 = vld [vmem:[#allocation10 + $0x70] sm:$0xff] }
  0xeb   :  { %628 = vmatpush.bf16.msrb.mxu0 %v1253_v25  ;;  %719 = vmatpush.bf16.msrb.mxu2 %v1265_v29  ;;  %v1279_v25 = vld [vmem:[#allocation16 + $0x20] sm:$0xff]  ;;  %v1278_v29 = vld [vmem:[#allocation16 + $0x18] sm:$0xff] }
  0xed   :  { %1028 = vmatmul.msk.bf16.vlgmr.msra.gmra.mxu1 %vm318_vm0, %v1720_v30 }
  0xef   :  { %629 = vmatpush.bf16.msrb.mxu0 %v1252_v26  ;;  %720 = vmatpush.bf16.msrb.mxu2 %v1264_v32  ;;  %v1276_v32 = vld [vmem:[#allocation16 + $0x8] sm:$0xff] }
  0xf3   :  { %630 = vmatpush.bf16.msrb.mxu0 %v1251_v27  ;;  %721 = vmatpush.bf16.msrb.mxu2 %v1263_v33  ;;  %v1275_v33 = vld [vmem:[#allocation16] sm:$0xff] }
  0xf7   :  { %722 = vmatpush.bf16.msrb.mxu2 %v1262_v38  ;;  %927 = vmatpush.bf16.msra.mxu0 %v1282_v22 }
  0xfb   :  { %723 = vmatpush.bf16.msrb.mxu2 %v1261_v39 }
  0xfd   :  { %1029 = vmatmul.msk.bf16.gmra.mxu1 %vm318_vm0, %v1724_v36 }
  0xff   :  { %724 = vmatpush.bf16.msrb.mxu2 %v1260_v40 }
 0x103   :  { %725 = vmatpush.bf16.msrb.mxu2 %v1259_v41  ;;  %v941_v41 = vlaneseq }
 0x16a   :  { %v334_v42 = vpop.f32.mrf.mxu1 }
 0x172   :  { %v336_v45 = vpop.f32.mrf.mxu1 }
 0x173   :  { %v344_v46 = vpack.c.bf16 %v336_v45, %v334_v42 }
 0x175   :  { %422 = vmatmul.bf16.vlgmr.msra.gmra.mxu2 %v344_v46 }
 0x17a   :  { %v339_v47 = vpop.f32.mrf.mxu1 }
 0x182   :  { %v341_v48 = vpop.f32.mrf.mxu1 }
 0x183   :  { %v345_v49 = vpack.c.bf16 %v341_v48, %v339_v47 }
 0x185   :  { %427 = vmatmul.bf16.gmra.mxu2 %v345_v49 }
 0x1f8   :  { %v423_v54 = vpop.f32.mrf.mxu2 }
 0x1f9   :  { %v424_v56 = vadd.f32 %v1304_v55, %v423_v54 }
 0x1fb   :  { %v433_v59 = vmax.f32 %v424_v56, 0.0 }
 0x200   :  { %v425_v57 = vpop.f32.mrf.mxu2 }
 0x201   :  { %v426_v58 = vadd.f32 %v1304_v55, %v425_v57  ;;  %v1307_v57 = vld [vmem:[#allocation12 + $0x1] ss:$0 sm:$0xff] }
 0x203   :  { %v434_v60 = vmax.f32 %v426_v58, 0.0 }
 0x205   :  { %v437_v61 = vpack.c.bf16 %v434_v60, %v433_v59 }
 0x207   :  { %515 = vmatmul.bf16.vlgmr.msra.gmra.mxu3 %v437_v61  ;;  %v1274_v61 = vld [vmem:[#allocation13 + $0x38] sm:$0xff] }
 0x208   :  { %v428_v62 = vpop.f32.mrf.mxu2 }
 0x209   :  { %v429_v63 = vadd.f32 %v1304_v55, %v428_v62 }
 0x20b   :  { %v435_v2 = vmax.f32 %v429_v63, 0.0  ;;  %v1273_v63 = vld [vmem:[#allocation13 + $0x30] sm:$0xff] }
 0x210   :  { %v430_v0 = vpop.f32.mrf.mxu2 }
 0x211   :  { %v431_v1 = vadd.f32 %v1304_v55, %v430_v0 }
 0x213   :  { %v436_v3 = vmax.f32 %v431_v1, 0.0 }
 0x215   :  { %v438_v4 = vpack.c.bf16 %v436_v3, %v435_v2  ;;  %v1272_v2 = vld [vmem:[#allocation13 + $0x28] sm:$0xff] }
 0x217   :  { %520 = vmatmul.bf16.gmra.mxu3 %v438_v4  ;;  %v1271_v4 = vld [vmem:[#allocation13 + $0x20] sm:$0xff] }
 0x28a   :  { %v516_v5 = vpop.f32.mrf.mxu3 }
 0x28b   :  { %v517_v15 = vadd.f32 %v1305_v8, %v516_v5 }
 0x28d   :  { %v526_v21 = vmax.f32 %v517_v15, 0.0 }
 0x292   :  { %v518_v6 = vpop.f32.mrf.mxu3 }
 0x293   :  { %v519_v13 = vadd.f32 %v1305_v8, %v518_v6 }
 0x295   :  { %v527_v19 = vmax.f32 %v519_v13, 0.0 }
 0x297   :  { %v530_v23 = vpack.c.bf16 %v527_v19, %v526_v21  ;;  %v1269_v19 = vld [vmem:[#allocation13 + $0x10] sm:$0xff]  ;;  %v1267_v21 = vld [vmem:[#allocation13] sm:$0xff] }
 0x29a   :  { %v521_v7 = vpop.f32.mrf.mxu3 }
 0x29b   :  { %v522_v10 = vadd.f32 %v1305_v8, %v521_v7  ;;  %v1270_v7 = vld [vmem:[#allocation13 + $0x18] sm:$0xff] }
 0x29d   :  { %v528_v16 = vmax.f32 %v522_v10, 0.0 }
 0x2a2   :  { %v523_v11 = vpop.f32.mrf.mxu3 }
 0x2a3   :  { %v524_v14 = vadd.f32 %v1305_v8, %v523_v11  ;;  %v1284_v8 = vld [vmem:[#allocation4] sm:$0xf]  }
 0x2a4   :  { %v1285_v11 = vunpack.c.0.s8 %v1284_v8  ;;  %v1286_v12 = vunpack.c.1.s8 %v1284_v8 }
 0x2a5   :  { %v529_v17 = vmax.f32 %v524_v14, 0.0 }
 0x2a6   :  { %v749_v15 = vcvt.s32.f32 %v1285_v11 }
 0x2a7   :  { %v531_v20 = vpack.c.bf16 %v529_v17, %v528_v16  ;;  %v750_v16 = vcvt.s32.f32 %v1286_v12 }
 0x2a9   :  { %538 = vmatpush.bf16.msrb.mxu1 %v531_v20  ;;  %v751_v18 = vpack.c.bf16 %v750_v16, %v749_v15  ;;  %v1268_v20 = vld [vmem:[#allocation13 + $0x8] sm:$0xff] }
 0x2ad   :  { %539 = vmatpush.bf16.msrb.mxu1 %v530_v23  ;;  %v1281_v23 = vld [vmem:[#allocation16 + $0x30] sm:$0xff] }
 0x2ae   :  { %928 = vmatpush.bf16.msra.mxu0 %v1281_v23 }
 0x2b0   :  { %1094 = vmatmul.msk.bf16.vlgmr.msrb.gmra.mxu1 %vm318_vm0, %v1720_v30 }
 0x2b1   :  { %842 = vmatpush.bf16.msra.mxu1 %v1274_v61 }
 0x2b2   :  { %929 = vmatpush.bf16.msra.mxu0 %v1280_v24 }
 0x2b5   :  { %843 = vmatpush.bf16.msra.mxu1 %v1273_v63 }
 0x2b6   :  { %930 = vmatpush.bf16.msra.mxu0 %v1279_v25 }
 0x2b9   :  { %844 = vmatpush.bf16.msra.mxu1 %v1272_v2 }
 0x2ba   :  { %931 = vmatpush.bf16.msra.mxu0 %v1278_v29 }
 0x2bd   :  { %845 = vmatpush.bf16.msra.mxu1 %v1271_v4 }
 0x2c0   :  { %1095 = vmatmul.msk.bf16.gmra.mxu1 %vm318_vm0, %v1724_v36 }
 0x2c1   :  { %846 = vmatpush.bf16.msra.mxu1 %v1270_v7 }
 0x2c5   :  { %847 = vmatpush.bf16.msra.mxu1 %v1269_v19 }
 0x2c9   :  { %848 = vmatpush.bf16.msra.mxu1 %v1268_v20 }
 0x2cd   :  { %849 = vmatpush.bf16.msra.mxu1 %v1267_v21 }
 0x32d   :  { %v541_v31 = vpop.f32.mrf.mxu1 }
 0x335   :  { %v543_v34 = vpop.f32.mrf.mxu1 }
 0x336   :  { %v551_v30 = vpack.c.bf16 %v543_v34, %v541_v31  ;;  %v1277_v31 = vld [vmem:[#allocation16 + $0x10] sm:$0xff] }
 0x337   :  { %932 = vmatpush.bf16.msra.mxu0 %v1277_v31 }
 0x338   :  { %631 = vmatmul.bf16.vlgmr.msrb.gmra.mxu0 %v551_v30  ;;  %v1308_v30 = vld [vmem:[#allocation15] ss:$0 sm:$0xff] }
 0x33b   :  { %933 = vmatpush.bf16.msra.mxu0 %v1276_v32 }
 0x33d   :  { %v546_v35 = vpop.f32.mrf.mxu1 }
 0x33f   :  { %934 = vmatpush.bf16.msra.mxu0 %v1275_v33 }
 0x345   :  { %v548_v36 = vpop.f32.mrf.mxu1 }
 0x346   :  { %v552_v37 = vpack.c.bf16 %v548_v36, %v546_v35 }
 0x348   :  { %636 = vmatmul.bf16.gmra.mxu0 %v552_v37 }
 0x3b5   :  { %v632_v42 = vpop.f32.mrf.mxu0 }
 0x3b6   :  { %v633_v44 = vadd.f32 %v1306_v43, %v632_v42  ;;  %v942_v42 = vand.u32 127, %v941_v41 }
 0x3b8   :  { %v642_v47 = vmax.f32 %v633_v44, 0.0  ;;  %vm943_vm1 = vcmp.lt.s32.totalorder %v942_v42, 4 }
 0x3bd   :  { %v634_v45 = vpop.f32.mrf.mxu0 }
 0x3be   :  { %v635_v46 = vadd.f32 %v1306_v43, %v634_v45 }
 0x3c0   :  { %v643_v48 = vmax.f32 %v635_v46, 0.0 }
 0x3c2   :  { %v646_v49 = vpack.c.bf16 %v643_v48, %v642_v47 }
 0x3c4   :  { %726 = vmatmul.bf16.vlgmr.msrb.gmra.mxu2 %v646_v49 }
 0x3c5   :  { %v637_v50 = vpop.f32.mrf.mxu0 }
 0x3c6   :  { %v638_v51 = vadd.f32 %v1306_v43, %v637_v50 }
 0x3c8   :  { %v644_v54 = vmax.f32 %v638_v51, 0.0 }
 0x3cd   :  { %v639_v52 = vpop.f32.mrf.mxu0 }
 0x3ce   :  { %v640_v53 = vadd.f32 %v1306_v43, %v639_v52  ;;  %v1309_v43 = vld [vmem:[%s1772_s12] ss:$0 sm:$0xff] }
 0x3d0   :  { %v645_v55 = vmax.f32 %v640_v53, 0.0 }
 0x3d2   :  { %v647_v56 = vpack.c.bf16 %v645_v55, %v644_v54 }
 0x3d4   :  { %731 = vmatmul.bf16.gmra.mxu2 %v647_v56 }
 0x447   :  { %v727_v58 = vpop.f32.mrf.mxu2 }
 0x448   :  { %v728_v59 = vadd.f32 %v1307_v57, %v727_v58 }
 0x44a   :  { %v737_v60 = vmax.f32 %v728_v59, 0.0 }
 0x44c   :  { %741 = vst [vmem:[%s1775_s15] sm:$0xff] %v737_v60 }
 0x44f   :  { %v729_v62 = vpop.f32.mrf.mxu2 }
 0x450   :  { %v730_v0 = vadd.f32 %v1307_v57, %v729_v62 }
 0x452   :  { %v738_v1 = vmax.f32 %v730_v0, 0.0 }
 0x454   :  { %742 = vst [vmem:[%s1775_s15 + $0x8] sm:$0xff] %v738_v1  ;;  %v752_v17 = vpack.c.bf16 %v738_v1, %v737_v60 }
 0x457   :  { %v732_v3 = vpop.f32.mrf.mxu2 }
 0x458   :  { %v733_v5 = vadd.f32 %v1307_v57, %v732_v3 }
 0x45a   :  { %v739_v6 = vmax.f32 %v733_v5, 0.0 }
 0x45c   :  { %743 = vst [vmem:[%s1775_s15 + $0x10] sm:$0xff] %v739_v6 }
 0x45f   :  { %v734_v9 = vpop.f32.mrf.mxu2 }
 0x460   :  { %v735_v10 = vadd.f32 %v1307_v57, %v734_v9 }
 0x462   :  { %v740_v13 = vmax.f32 %v735_v10, 0.0 }
 0x464   :  { %744 = vst [vmem:[%s1775_s15 + $0x18] sm:$0xff] %v740_v13  ;;  %v753_v14 = vpack.c.bf16 %v740_v13, %v739_v6 }
 0x466   :  { %763 = vmatpush.bf16.msrb.mxu3 %v753_v14 }
 0x46a   :  { %764 = vmatpush.bf16.msrb.mxu3 %v752_v17 }
 0x46d   :  { %1160 = vmatmul.msk.bf16.vlgmr.msrb.gmra.mxu3 %vm318_vm0, %v751_v18 }
 0x4f0   :  { %v766_v26 = vpop.f32.mrf.mxu3 }
 0x4f1   :  { %771 = vst [vmem:[%s1774_s14] sm:$0xff] %v766_v26 }
 0x4f8   :  { %v768_v27 = vpop.f32.mrf.mxu3 }
 0x4f9   :  { %772 = vst [vmem:[%s1774_s14 + $0x8] sm:$0xff] %v768_v27  ;;  %v773_v28 = vpack.c.bf16 %v768_v27, %v766_v26 }
 0x4fb   :  { %850 = vmatmul.bf16.vlgmr.msra.gmra.mxu1 %v773_v28 }
 0x578   :  { %v851_v34 = vpop.f32.mrf.mxu1 }
 0x579   :  { %v852_v35 = vadd.f32 %v1308_v30, %v851_v34 }
 0x57b   :  { %v856_v38 = vmax.f32 %v852_v35, 0.0 }
 0x580   :  { %v853_v36 = vpop.f32.mrf.mxu1 }
 0x581   :  { %v854_v37 = vadd.f32 %v1308_v30, %v853_v36 }
 0x583   :  { %v857_v39 = vmax.f32 %v854_v37, 0.0 }
 0x585   :  { %v858_v40 = vpack.c.bf16 %v857_v39, %v856_v38 }
 0x587   :  { %935 = vmatmul.bf16.vlgmr.msra.gmra.mxu0 %v858_v40 }
 0x604   :  { %v936_v44 = vpop.f32.mrf.mxu0 }
 0x605   :  { %v937_v45 = vadd.f32 %v1309_v43, %v936_v44 }
 0x607   :  { %v944_v46 = vsel %vm943_vm1, %v937_v45, -1e+30 }
 0x608   :  { %946 = vmax.xlane.f32.xlu0 %v944_v46 }
 0x60c   :  { %v938_v47 = vpop.f32.mrf.mxu0 }
 0x60d   :  { %v939_v48 = vadd.f32 %v1309_v43, %v938_v47 }
 0x60f   :  { %v945_v49 = vsel %vm943_vm1, %v939_v48, -1e+30 }
 0x610   :  { %948 = vmax.xlane.f32.xlu0 %v945_v49 }
 0x67b   :  { %v947_v50 = vpop.xlane.xlu0 %946 }
 0x67c   :  { %v950_v51 = vsub.f32 %v944_v46, %v947_v50 }
 0x67e   :  { %v952_v52 = vmul.f32 1.442695, %v950_v51 }
 0x680   :  { %1310 = vpow2.f32 %v952_v52 }
 0x683   :  { %v949_v53 = vpop.xlane.xlu0 %948 }
 0x684   :  { %v951_v54 = vsub.f32 %v945_v49, %v949_v53 }
 0x686   :  { %v1311_v55 = vpop.eup %1310  ;;  %v954_v56 = vmul.f32 1.442695, %v951_v54 }
 0x687   :  { %956 = vadd.xlane.f32.xlu1 %v1311_v55 }
 0x688   :  { %1312 = vpow2.f32 %v954_v56 }
 0x68e   :  { %v1313_v57 = vpop.eup %1312 }
 0x68f   :  { %958 = vadd.xlane.f32.xlu1 %v1313_v57 }
 0x6fa   :  { %v957_v58 = vpop.xlane.xlu1 %956 }
 0x6fb   :  { %1314 = vlog2.f32 %v957_v58 }
 0x701   :  { %v1315_v59 = vpop.eup %1314 }
 0x702   :  { %v961_v60 = vmul.f32 0.6931472, %v1315_v59  ;;  %v959_v61 = vpop.xlane.xlu1 %958 }
 0x703   :  { %1316 = vlog2.f32 %v959_v61 }
 0x704   :  { %v964_v62 = vadd.f32 %v961_v60, %v947_v50 }
 0x706   :  { %v966_v63 = vsub.f32 %v944_v46, %v964_v62 }
 0x708   :  { %968 = vst [vmem:[%s1773_s13] sm:$0xff] %v966_v63 }
 0x709   :  { %v1317_v0 = vpop.eup %1316 }
 0x70a   :  { %v963_v1 = vmul.f32 0.6931472, %v1317_v0 }
 0x70c   :  { %v965_v2 = vadd.f32 %v963_v1, %v949_v53 }
 0x70e   :  { %v967_v3 = vsub.f32 %v945_v49, %v965_v2 }
 0x710   :  { %969 = vst [vmem:[%s1773_s13 + $0x8] sm:$0xff] %v967_v3 }
 0x711   :  { %982 = vsyncpa [#allocation3], 1 }
 0x712   :  { %983 = vsyncpa [#allocation5], 1 }
 0x713   :  { %984 = vsyncpa [#allocation8], 1 }
 0x714   :  { %985 = vsyncpa [#allocation11], 1 }
 0x715   :  { %986 = vsyncpa [#allocation14], 1 }
 0x716   :  { %987 = vsyncpa [#allocation17], 1 }

</bundles_post_ra>
